<compile_context>
chip_gen: v6e
topology: v6e:2x2x1
jax: 0.10.0
libtpu: 0.0.40
codegen_flags: <defaults>
</compile_context>

<pallas_src>
import functools
import math

import jax
import jax.numpy as jnp
from jax import lax
from jax.experimental import pallas as pl
from jax.experimental.pallas import tpu as pltpu

LANE = 128
SUBLANE = 8


def _round_up(x, m):
    return ((x + m - 1) // m) * m


def topk_router_kernel(x_ref, w_ref, b_ref, probs_ref, idx_ref, *,
                       ne_pad, active_experts):
    # x_ref: (TM, E)   w_ref: (E, NE_pad)   b_ref: (1, NE_pad)
    logits = jnp.dot(x_ref[...], w_ref[...],
                     preferred_element_type=jnp.float32) + b_ref[...]

    tm = logits.shape[0]
    a_pad = idx_ref.shape[-1]
    neg_inf = jnp.float32(-jnp.inf)

    col = lax.broadcasted_iota(jnp.int32, (tm, ne_pad), 1)
    kcol = lax.broadcasted_iota(jnp.int32, (tm, a_pad), 1)

    taken = jnp.zeros((tm, ne_pad), jnp.bool_)
    idx = jnp.zeros((tm, a_pad), jnp.int32)

    # Iterative top-k: argmax + mask, selecting in descending-value order
    # (matches torch.topk's sorted=True default).
    # TODO(synk): exact-tie order is impl-defined in torch.topk; we break ties
    # toward the lowest expert index.
    for k in range(active_experts):
        cur = jnp.where(taken, neg_inf, logits)
        m = jnp.max(cur, axis=-1, keepdims=True)
        cand = (cur == m) & jnp.logical_not(taken)
        sel = jnp.min(jnp.where(cand, col, ne_pad), axis=-1, keepdims=True)
        taken = taken | (cand & (col == sel))
        idx = jnp.where(kcol == k, sel, idx)

    # masked_fill(mask == 0, -inf) + softmax over experts (exact divide so each
    # row sums to 1 within f32 rounding).
    masked = jnp.where(taken, logits, neg_inf)
    mx = jnp.max(masked, axis=-1, keepdims=True)
    ex = jnp.exp(masked - mx)                        # -inf entries -> exactly 0
    s = jnp.sum(ex, axis=-1, keepdims=True)          # >= 1 always (max entry)

    probs_ref[...] = ex / s
    idx_ref[...] = idx


def _choose_row_tile(n, max_tile=1024):
    """Row tile: multiple of 8, capped, and (when possible) >= 2 grid steps."""
    n8 = _round_up(max(n, 1), SUBLANE)
    tm = min(max_tile, n8)
    if n8 > SUBLANE:
        # Keep at least 2 grid steps so v7x can shard the parallel axis across
        # its 2 TensorCores; harmless on v5e/v6e.
        tm = min(tm, _round_up(pl.cdiv(n8, 2), SUBLANE))
    return tm


def topk_router_forward(x, w, b, *, num_experts, active_experts,
                        row_tile_cap=1024):
    """x: (..., E) (native dtype, e.g. bf16); w: (E, num_experts) == torch W.T;
    b: (num_experts,) or (1, num_experts)."""
    orig_lead = x.shape[:-1]
    E = x.shape[-1]
    N = math.prod(orig_lead) if orig_lead else 1

    x2 = x.reshape(N, E)                       # no dtype upcast (HBM-read bound)
    compute_dtype = x2.dtype

    # --- pad expert dim to a full lane width (dense stores, one MXU tile) ---
    ne_pad = max(LANE, _round_up(num_experts, LANE))
    a_pad = _round_up(active_experts, SUBLANE)

    w_p = jnp.zeros((E, ne_pad), compute_dtype).at[:, :num_experts].set(
        w.astype(compute_dtype))
    b2 = jnp.asarray(b, jnp.float32).reshape(1, -1)
    # Padded columns get a large finite negative bias (not -inf) so they are
    # never selected and never poison the pre-mask max/compare path.
    b_p = jnp.full((1, ne_pad), -1e30, jnp.float32).at[:, :num_experts].set(b2)

    # --- row tiling: pad N up to a multiple of the tile (no full-N fallback) --
    tm = _choose_row_tile(N, row_tile_cap)
    n_pad = _round_up(_round_up(N, SUBLANE), tm)
    if n_pad != N:
        x2 = jnp.pad(x2, ((0, n_pad - N), (0, 0)))
    grid = (n_pad // tm,)

    # --- vmem limit from actual footprint (+ headroom), not hardcoded 64 MiB --
    xi = jnp.dtype(compute_dtype).itemsize
    per_step = (tm * E * xi + tm * ne_pad * 4 + tm * a_pad * 4
                + E * ne_pad * xi + ne_pad * 4)
    vmem_needed = 2 * per_step                            # double-buffered
    vmem_limit = max(4 * 1024 * 1024,
                     min(32 * 1024 * 1024, 2 * vmem_needed + 2 * 1024 * 1024))

    cost = pl.CostEstimate(
        flops=2 * n_pad * E * ne_pad,
        transcendentals=n_pad * ne_pad,
        bytes_accessed=(n_pad * E * xi + E * ne_pad * xi + ne_pad * 4
                        + n_pad * ne_pad * 4 + n_pad * a_pad * 4),
    )

    kern = functools.partial(topk_router_kernel,
                             ne_pad=ne_pad,
                             active_experts=active_experts)

    probs, idx = pl.pallas_call(
        kern,
        out_shape=(jax.ShapeDtypeStruct((n_pad, ne_pad), jnp.float32),
                   jax.ShapeDtypeStruct((n_pad, a_pad), jnp.int32)),
        grid_spec=pltpu.PrefetchScalarGridSpec(
            num_scalar_prefetch=0,
            grid=grid,
            in_specs=[
                pl.BlockSpec((tm, E), lambda i: (i, 0)),            # x rows
                pl.BlockSpec((E, ne_pad), lambda i: (0, 0)),        # router W
                pl.BlockSpec((1, ne_pad), lambda i: (0, 0)),        # router b
            ],
            out_specs=[
                pl.BlockSpec((tm, ne_pad), lambda i: (i, 0)),       # probs
                pl.BlockSpec((tm, a_pad), lambda i: (i, 0)),        # indices
            ],
        ),
        compiler_params=pltpu.CompilerParams(
            dimension_semantics=("parallel",),
            vmem_limit_bytes=int(vmem_limit),
        ),
        cost_estimate=cost,
    )(x2, w_p, b_p)

    probs = probs[:N, :num_experts].reshape(orig_lead + (num_experts,))
    idx = idx[:N, :active_experts].reshape(orig_lead + (active_experts,))
    return probs, idx


if __name__ == "__main__":
    B, T, E = 2, 8, 32
    num_experts, active_experts = 8, 2

    key = jax.random.PRNGKey(0)
    kx, kw, kb = jax.random.split(key, 3)

    # bf16 activations/weights (native MXU dtype); router math stays f32.
    x = jax.random.normal(kx, (B, T, E), jnp.bfloat16)
    w = (0.1 * jax.random.normal(kw, (E, num_experts), jnp.float32)
         ).astype(jnp.bfloat16)
    b = 0.01 * jax.random.normal(kb, (1, num_experts), jnp.float32)

    probs, idx = topk_router_forward(x, w, b,
                                     num_experts=num_experts,
                                     active_experts=active_experts)
    jax.block_until_ready((probs, idx))

    assert probs.shape == (B, T, num_experts) and probs.dtype == jnp.float32
    assert idx.shape == (B, T, active_experts) and idx.dtype == jnp.int32

    # Rows sum to ~1 and exactly `active_experts` entries are non-zero.
    assert bool(jnp.all(jnp.abs(jnp.sum(probs, axis=-1) - 1.0) < 1e-3))
    assert bool(jnp.all(jnp.sum((probs > 0).astype(jnp.int32), axis=-1)
                        == active_experts))
    # Indices are valid and point at the selected (non-zero) experts.
    assert bool(jnp.all((idx >= 0) & (idx < num_experts)))
    assert bool(jnp.all(jnp.take_along_axis(probs, idx, axis=-1) > 0))

    # Pure-JAX reference (same f32-accumulated matmul + masked softmax).
    logits_ref = (jnp.dot(x, w, preferred_element_type=jnp.float32)
                  + b.astype(jnp.float32))
    _, idx_ref = lax.top_k(logits_ref, active_experts)
    mask_ref = jnp.zeros_like(logits_ref).at[
        jnp.arange(B)[:, None, None], jnp.arange(T)[None, :, None], idx_ref
    ].set(1.0)
    probs_ref = jax.nn.softmax(
        jnp.where(mask_ref == 0, -jnp.inf, logits_ref), axis=-1)
    assert bool(jnp.all(jnp.abs(probs - probs_ref) < 2e-3))

    print("KERNEL_OK")
</pallas_src>

<mosaic_0001>
module attributes {stable_mosaic.version = 11 : i64} {
  func.func @topk_router_kernel(%arg0: i32, %arg1: memref<8x32xbf16, #tpu.memory_space<vmem>>, %arg2: memref<32x128xbf16, #tpu.memory_space<vmem>>, %arg3: memref<1x128xf32, #tpu.memory_space<vmem>>, %arg4: memref<8x128xf32, #tpu.memory_space<vmem>>, %arg5: memref<8x8xi32, #tpu.memory_space<vmem>>) attributes {dimension_semantics = [#tpu.dimension_semantics<parallel>], iteration_bounds = array<i64: 2>, scalar_prefetch = 0 : i64, scratch_operands = 0 : i64, tpu.core_type = #tpu.core_type<tc>, window_params = [{transform_indices = @transform_0, window_bounds = array<i64: 8, 32>}, {pipeline_mode = #tpu.pipeline_mode<synchronous>, transform_indices = @transform_1, window_bounds = array<i64: 32, 128>}, {pipeline_mode = #tpu.pipeline_mode<synchronous>, transform_indices = @transform_2, window_bounds = array<i64: 1, 128>}, {transform_indices = @transform_3, window_bounds = array<i64: 8, 128>}, {transform_indices = @transform_4, window_bounds = array<i64: 8, 8>}]} {
    %c0 = arith.constant 0 : index
    %c0_0 = arith.constant 0 : index
    %0 = vector.load %arg1[%c0, %c0_0] : memref<8x32xbf16, #tpu.memory_space<vmem>>, vector<8x32xbf16>
    %c0_1 = arith.constant 0 : index
    %c0_2 = arith.constant 0 : index
    %1 = vector.load %arg2[%c0_1, %c0_2] : memref<32x128xbf16, #tpu.memory_space<vmem>>, vector<32x128xbf16>
    %cst = arith.constant dense<0.000000e+00> : vector<8x128xf32>
    %2 = tpu.matmul %0, %1, %cst {dimension_numbers = #tpu.dot_dimension_numbers<[1], [0], [0], [1], [0, 0, 1, 1], [], []>} : vector<8x32xbf16>, vector<32x128xbf16>, vector<8x128xf32> -> vector<8x128xf32>
    %c0_3 = arith.constant 0 : index
    %c0_4 = arith.constant 0 : index
    %3 = vector.load %arg3[%c0_3, %c0_4] : memref<1x128xf32, #tpu.memory_space<vmem>>, vector<1x128xf32>
    %4 = vector.broadcast %3 : vector<1x128xf32> to vector<8x128xf32>
    %5 = arith.addf %2, %4 : vector<8x128xf32>
    %6 = tpu.iota {dimensions = array<i32: 1>} : vector<8x128xi32>
    %7 = tpu.iota {dimensions = array<i32: 1>} : vector<8x8xi32>
    %false = arith.constant false
    %8 = vector.broadcast %false : i1 to vector<8x128xi1>
    %c0_i32 = arith.constant 0 : i32
    %9 = vector.broadcast %c0_i32 : i32 to vector<8x8xi32>
    %cst_5 = arith.constant 0xFF800000 : f32
    %10 = vector.broadcast %cst_5 : f32 to vector<8x128xf32>
    %11 = arith.select %8, %10, %5 : vector<8x128xi1>, vector<8x128xf32>
    %cst_6 = arith.constant dense<0xFF800000> : vector<8xf32>
    %12 = vector.multi_reduction <maximumf>, %11, %cst_6 [1] : vector<8x128xf32> to vector<8xf32>
    %13 = vector.shape_cast %12 : vector<8xf32> to vector<8x1xf32>
    %14 = vector.broadcast %13 : vector<8x1xf32> to vector<8x128xf32>
    %15 = arith.cmpf oeq, %11, %14 : vector<8x128xf32>
    %cst_7 = arith.constant dense<true> : vector<8x128xi1>
    %16 = arith.xori %8, %cst_7 : vector<8x128xi1>
    %17 = arith.andi %15, %16 : vector<8x128xi1>
    %c128_i32 = arith.constant 128 : i32
    %18 = vector.broadcast %c128_i32 : i32 to vector<8x128xi32>
    %19 = arith.select %17, %6, %18 : vector<8x128xi1>, vector<8x128xi32>
    %cst_8 = arith.constant dense<2147483647> : vector<8xi32>
    %20 = vector.multi_reduction <minsi>, %19, %cst_8 [1] : vector<8x128xi32> to vector<8xi32>
    %21 = vector.shape_cast %20 : vector<8xi32> to vector<8x1xi32>
    %22 = vector.broadcast %21 : vector<8x1xi32> to vector<8x128xi32>
    %23 = arith.cmpi eq, %6, %22 : vector<8x128xi32>
    %24 = arith.andi %17, %23 : vector<8x128xi1>
    %25 = arith.ori %8, %24 : vector<8x128xi1>
    %c0_i32_9 = arith.constant 0 : i32
    %26 = vector.broadcast %c0_i32_9 : i32 to vector<8x8xi32>
    %27 = arith.cmpi eq, %7, %26 : vector<8x8xi32>
    %28 = vector.shape_cast %21 : vector<8x1xi32> to vector<8x1xi32>
    %29 = vector.broadcast %28 : vector<8x1xi32> to vector<8x8xi32>
    %30 = arith.select %27, %29, %9 : vector<8x8xi1>, vector<8x8xi32>
    %cst_10 = arith.constant 0xFF800000 : f32
    %31 = vector.broadcast %cst_10 : f32 to vector<8x128xf32>
    %32 = arith.select %25, %31, %5 : vector<8x128xi1>, vector<8x128xf32>
    %cst_11 = arith.constant dense<0xFF800000> : vector<8xf32>
    %33 = vector.multi_reduction <maximumf>, %32, %cst_11 [1] : vector<8x128xf32> to vector<8xf32>
    %34 = vector.shape_cast %33 : vector<8xf32> to vector<8x1xf32>
    %35 = vector.broadcast %34 : vector<8x1xf32> to vector<8x128xf32>
    %36 = arith.cmpf oeq, %32, %35 : vector<8x128xf32>
    %cst_12 = arith.constant dense<true> : vector<8x128xi1>
    %37 = arith.xori %25, %cst_12 : vector<8x128xi1>
    %38 = arith.andi %36, %37 : vector<8x128xi1>
    %c128_i32_13 = arith.constant 128 : i32
    %39 = vector.broadcast %c128_i32_13 : i32 to vector<8x128xi32>
    %40 = arith.select %38, %6, %39 : vector<8x128xi1>, vector<8x128xi32>
    %cst_14 = arith.constant dense<2147483647> : vector<8xi32>
    %41 = vector.multi_reduction <minsi>, %40, %cst_14 [1] : vector<8x128xi32> to vector<8xi32>
    %42 = vector.shape_cast %41 : vector<8xi32> to vector<8x1xi32>
    %43 = vector.broadcast %42 : vector<8x1xi32> to vector<8x128xi32>
    %44 = arith.cmpi eq, %6, %43 : vector<8x128xi32>
    %45 = arith.andi %38, %44 : vector<8x128xi1>
    %46 = arith.ori %25, %45 : vector<8x128xi1>
    %c1_i32 = arith.constant 1 : i32
    %47 = vector.broadcast %c1_i32 : i32 to vector<8x8xi32>
    %48 = arith.cmpi eq, %7, %47 : vector<8x8xi32>
    %49 = vector.shape_cast %42 : vector<8x1xi32> to vector<8x1xi32>
    %50 = vector.broadcast %49 : vector<8x1xi32> to vector<8x8xi32>
    %51 = arith.select %48, %50, %30 : vector<8x8xi1>, vector<8x8xi32>
    %cst_15 = arith.constant 0xFF800000 : f32
    %52 = vector.broadcast %cst_15 : f32 to vector<8x128xf32>
    %53 = arith.select %46, %5, %52 : vector<8x128xi1>, vector<8x128xf32>
    %cst_16 = arith.constant dense<0xFF800000> : vector<8xf32>
    %54 = vector.multi_reduction <maximumf>, %53, %cst_16 [1] : vector<8x128xf32> to vector<8xf32>
    %55 = vector.shape_cast %54 : vector<8xf32> to vector<8x1xf32>
    %56 = vector.broadcast %55 : vector<8x1xf32> to vector<8x128xf32>
    %57 = arith.subf %53, %56 : vector<8x128xf32>
    %58 = math.exp %57 : vector<8x128xf32>
    %cst_17 = arith.constant dense<0.000000e+00> : vector<8xf32>
    %59 = vector.multi_reduction <add>, %58, %cst_17 [1] : vector<8x128xf32> to vector<8xf32>
    %60 = vector.shape_cast %59 : vector<8xf32> to vector<8x1xf32>
    %61 = vector.broadcast %60 : vector<8x1xf32> to vector<8x128xf32>
    %62 = arith.divf %58, %61 : vector<8x128xf32>
    %c0_18 = arith.constant 0 : index
    %c0_19 = arith.constant 0 : index
    %63 = vector.load %arg4[%c0_18, %c0_19] : memref<8x128xf32, #tpu.memory_space<vmem>>, vector<8x128xf32>
    tpu.vector_store %arg4[%c0_18, %c0_19], %62 {strides = array<i32>} : memref<8x128xf32, #tpu.memory_space<vmem>>, vector<8x128xf32>,
    %c0_20 = arith.constant 0 : index
    %c0_21 = arith.constant 0 : index
    %64 = vector.load %arg5[%c0_20, %c0_21] : memref<8x8xi32, #tpu.memory_space<vmem>>, vector<8x8xi32>
    tpu.vector_store %arg5[%c0_20, %c0_21], %51 {strides = array<i32>} : memref<8x8xi32, #tpu.memory_space<vmem>>, vector<8x8xi32>,
    return
  }
  func.func @transform_0(%arg0: i32) -> (i32, i32) {
    %c0_i32 = arith.constant 0 : i32
    %c0_i32_0 = arith.constant 0 : i32
    return %arg0, %c0_i32 : i32, i32
  }
  func.func @transform_1(%arg0: i32) -> (i32, i32) {
    %c0_i32 = arith.constant 0 : i32
    %c0_i32_0 = arith.constant 0 : i32
    %c0_i32_1 = arith.constant 0 : i32
    return %c0_i32, %c0_i32_0 : i32, i32
  }
  func.func @transform_2(%arg0: i32) -> (i32, i32) {
    %c0_i32 = arith.constant 0 : i32
    %c0_i32_0 = arith.constant 0 : i32
    %c0_i32_1 = arith.constant 0 : i32
    return %c0_i32, %c0_i32_0 : i32, i32
  }
  func.func @transform_3(%arg0: i32) -> (i32, i32) {
    %c0_i32 = arith.constant 0 : i32
    %c0_i32_0 = arith.constant 0 : i32
    return %arg0, %c0_i32 : i32, i32
  }
  func.func @transform_4(%arg0: i32) -> (i32, i32) {
    %c0_i32 = arith.constant 0 : i32
    %c0_i32_0 = arith.constant 0 : i32
    return %arg0, %c0_i32 : i32, i32
  }
}

</mosaic_0001>

<bundles_post_ra>
// kernel: tpu_custom_call.1
= control target key start
LH: loop header
LB: loop body
LE: loop exit
PB: predicated region body
PF: predicated region fallthrough
CT: control target
= control target key end

     0   :  { %10 = vsyncpa [#allocation3], 0  ;;  %s934_s0 = inlined_call_operand.hbm [shape: bf16[16,32], index: 0, kind: input, shape index: {}]   ;;  %s935_s1 = inlined_call_operand.hbm [shape: bf16[32,128], index: 1, kind: input, shape index: {}]   ;;  %s936_s2 = inlined_call_operand.vmem [shape: f32[1,128], index: 2, kind: input, shape index: {}]   ;;  %s937_s3 = inlined_call_operand.hbm [shape: f32[16,128], index: 3, kind: output, shape index: {0}]   ;;  %s938_s4 = inlined_call_operand.vmem [shape: s32[16,8], index: 4, kind: output, shape index: {1}]  }
   0x1   :  { %12 = vsyncpa [#allocation3 + $0x1], 0 }
   0x2   :  { %13 = vsyncpa [#allocation6], 0 }
   0x3   :  { %14 = vsyncpa [#allocation4], 0 }
   0x4   :  { %16 = vsyncpa [#allocation4 + $0x1], 0  ;;  %s751_s15 = smov 0   ;;  %s753_s16 = smov 0  }
   0x5   :  { %s755_s17 = smov 0   ;;  %s757_s18 = smov 0  }
   0x6 LB: > { %s772_s19 = sadd.s32 4294967295, %s716_s18   ;;  %s496_s20 = sadd.s32 4294967294, %s716_s18   ;;  %s716_s18 = sphi %s757_s18, %s964_s18   ;;  %s712_s17 = sphi %s755_s17, %s963_s17   ;;  %s708_s16 = sphi %s753_s16, %s962_s16   ;;  %s704_s15 = sphi %s751_s15, %s961_s15  }
   0x7   : > { %p42_p0 = scmp.ne.s32.totalorder %s708_s16, %s704_s15  ;;  %p939_p1 = scmp.eq.s32.totalorder %s772_s19, 0 }
   0x8   : > { %p114_p3 = scmp.eq.s32.totalorder %s496_s20, 1  ;;  %p497_p5 = scmp.ge.s32.totalorder %s716_s18, 1 }
   0x9   : > { %p781_p4 = por %p939_p1, %p42_p0  ;;  %p147_p7 = scmp.lt.s32.totalorder %s716_s18, 3 }
   0xa   : > { %p786_p6 = por %p114_p3, %p42_p0  ;;  %s718_s24 = smov [#allocation5]  }
   0xb   : > { %s943_s21 = scalar_select %p781_p4, 1, 0 }
   0xc   : > { %s944_s22 = scalar_select %p786_p6, 1, 0 }
   0xd   : > { %p791_p8 = pnand %p497_p5, %p147_p7  ;;  %s159_s25 = sshll.u32 %s718_s24, 4  ;;  %s160_s25 = int_to_ptr.vmem [resolvable:$true] %s159_s25 }
   0xe   : > { %s805_s27 = sadd.s32 1, %s716_s18   ;;  %s29_s28 = sadd.s32 1, %s712_s17 }
   0xf   : > { %s945_s23 = scalar_select %p791_p8, 1, 0 }
  0x10   : > { %p534_p9 = pneg %p791_p8  ;;  %s26_s29 = ssub.s32 %s716_s18, %s805_s27 }
  0x11   : > { %s605_s30 = scalar_lea.vmem %s160_s25, 256  ;;  %p613_p5 = scmp.lt.s32.totalorder %s160_s25, %s160_s25 }
  0x12   : > { %p800_p11 = pnand %p534_p9, %p939_p1  ;;  %p606_p13 = scmp.ne.s32.totalorder %s160_s25, %s605_s30 }
  0x13   : > { %p614_p7 = scmp.lt.s32.totalorder %s605_s30, %s605_s30 }
  0x14   : > { %p596_p12 = pneg %p800_p11 }
  0x15   : > { %p615_p10 = por %p614_p7, %p613_p5 }
  0x16   : > { %p608_p0 = pnand %p606_p13, %p596_p12 }
  0x18   : > { %p609_p3 = pneg %p608_p0 }
  0x1a   : > { %p616_p2 = pnand %p615_p10, %p609_p3 }
  0x1c   : > { %619 = shalt.err (!%p616_p2)
}
  0x1d   : > { %s719_s5 = smov 64   ;;  %s720_s6 = smov 4  }
  0x1e   : > { %537 = dma.hbm_to_vmem [thread:$0]  (!%p800_p11), %s935_s1, 256, %s160_s25, [#allocation6], %s719_s5, %s719_s5, %s720_s6  }
  0x1f   : > { %p27_p9 = scmp.eq.s32.totalorder %s26_s29, 0  ;;  %p36_p12 = scmp.ne.s32.totalorder %s712_s17, %s708_s16 }
  0x20   : > { %p37_p10 = scmp.eq.s32.totalorder %s716_s18, 0  ;;  %p547_p2 = scmp.lt.s32.totalorder %s716_s18, 2 }
  0x21   : > { %s822_s9 = scalar_select %p27_p9, %s712_s17, %s29_s28  }
  0x22   : > { %p38_p13 = por %p37_p10, %p36_p12  ;;  %p947_p0 = scmp.eq.s32.totalorder %s772_s19, 1 }
  0x23   : > { %s176_s11 = sand.u32 1, %s712_s17   ;;  %s501_s12 = sshll.u32 %s716_s18, 6 }
  0x24   : > { %p826_p3 = por %p947_p0, %p36_p12  ;;  %s500_s13 = sshll.u32 %s176_s11, 2 }
  0x25   : > { %s835_s24 = scalar_lea.hbm %s934_s0, %s501_s12  ;;  %s180_s25 = scalar_lea.vmem [#allocation2], %s500_s13 }
  0x26   : > { %s948_s10 = scalar_select %p826_p3, 1, 0 }
  0x27   : > { %s187_s26 = sshll.u32 %s180_s25, 4  ;;  %p837_p11 = pnand %p547_p2, %p38_p13  ;;  %s188_s26 = int_to_ptr.vmem [resolvable:$true] %s187_s26 }
  0x28   : > { %s177_s29 = scalar_lea.sflag [#allocation3], %s176_s11  ;;  %s620_s30 = scalar_lea.hbm %s835_s24, 64 }
  0x29   : > { %p621_p5 = scmp.ne.s32.totalorder %s835_s24, %s620_s30  ;;  %p622_p7 = pneg %p837_p11 }
  0x2a   : > { %s625_s7 = scalar_lea.hbm %s934_s0, 128  ;;  %p626_p10 = scmp.lt.s32.totalorder %s835_s24, %s934_s0 }
  0x2b   : > { %p623_p9 = pnand %p622_p7, %p621_p5  ;;  %p627_p2 = scmp.lt.s32.totalorder %s625_s7, %s620_s30 }
  0x2d   : > { %p624_p12 = pneg %p623_p9  ;;  %p628_p13 = por %p627_p2, %p626_p10 }
  0x2f   : > { %p629_p0 = pnand %p628_p13, %p624_p12 }
  0x31   : > { %632 = shalt.err (!%p629_p0)
}
  0x32   : > { %s633_s13 = scalar_lea.vmem %s188_s26, 64  ;;  %s721_s11 = smov [#allocation2]  }
  0x33   : > { %p634_p1 = scmp.ne.s32.totalorder %s188_s26, %s633_s13  ;;  %s638_s14 = sshll.u32 %s721_s11, 4  ;;  %s639_s14 = int_to_ptr.vmem [resolvable:$false] %s638_s14 }
  0x34   : > { %s640_s20 = scalar_lea.vmem %s639_s14, 128  ;;  %p641_p5 = scmp.lt.s32.totalorder %s188_s26, %s639_s14 }
  0x35   : > { %p636_p6 = pnand %p634_p1, %p622_p7  ;;  %p642_p9 = scmp.lt.s32.totalorder %s640_s20, %s633_s13 }
  0x37   : > { %p637_p3 = pneg %p636_p6  ;;  %p643_p4 = por %p642_p9, %p641_p5 }
  0x39   : > { %p644_p8 = pnand %p643_p4, %p637_p3 }
  0x3b   : > { %647 = shalt.err (!%p644_p8)
}
  0x3c   : > { %541 = dma.hbm_to_vmem [thread:$0]  (!%p837_p11), %s835_s24, 64, %s188_s26, %s177_s29  }
  0x3d   : > { %p950_p12 = scmp.ne.s32.totalorder %s945_s23, 0 }
  0x3e   : > { %s858_s25 = sand.u32 (!%p950_p12), 1, %s708_s16   ;;  %p951_p1 = scmp.ne.s32.totalorder (!%p950_p12), %s943_s21, 0 }
  0x3f   : > { %196 = sbr.rel (%p950_p12) target bundleno = 1459 (0x5b3), region = 32  ;;  %s503_s30 = sshll.u32 (!%p950_p12), %s858_s25, 2 }
  0x40   : > { %s199_s5 = scalar_lea.sflag (!%p950_p12), [#allocation3], %s858_s25  ;;  %s202_s6 = scalar_lea.vmem (!%p950_p12), [#allocation2], %s503_s30 }
  0x44   : > { %691 = dma.done.wait (%p951_p1), %s199_s5, 64  }
  0x45   : > { %693 = vsyncadd (%p951_p1), %s199_s5, 4294967232  ;;  %p952_p4 = scmp.eq.s32.totalorder %s772_s19, 0 }
  0x47   : > { %695 = dma.done.wait (%p952_p4), [#allocation6], 256   ;;  %p953_p6 = pmov %p952_p4 }
  0x48   : > { %v722_v0 = vmov 0.0   ;;  %vm723_vm0 = vmmov 0   ;;  %v588_v1 = vld [vmem:[#allocation5 + $0x8] sm:$0xff]   ;;  %v589_v2 = vld [vmem:[#allocation5] sm:$0xff]   ;;  %v240_v3 = vld [vmem:[%s202_s6] sm:$0xf]  ;;  %v308_v10 = vlaneseq }
  0x49   : > { %697 = vsyncadd (%p953_p6), [#allocation6], 4294967040  ;;  %518 = vmatprep.subr.bf16.mxu0 %v722_v0  ;;  %522 = vmatprep.mubr.msk.bf16.mxu0 %vm723_vm0, %v722_v0  ;;  %vm264_vm1 = vcmask 261120   ;;  %v507_v4 = vld [vmem:[%s936_s2] ss:$0 sm:$0xff]  ;;  %vm724_vm6 = vmmov 1  }
  0x4a   : > { %519 = vmatpush3.bf16.msra.mxu0 %v588_v1  ;;  %v309_v11 = vand.u32 127, %v308_v10  ;;  %p235_p8 = scmp.lt.s32.totalorder %s772_s19, 1  ;;  %vm369_vm13 = vcmask 64512   ;;  %s505_s8 = sshll.u32 %s858_s25, 3 }
  0x4b   : > { %520 = vmatprep.subr.bf16.mxu0 %v722_v0  ;;  %s512_s12 = sshll.u32 %s772_s19, 7  ;;  %s228_s13 = scalar_lea.vmem [#allocation7], %s505_s8 }
  0x4c   : > { %s236_s24 = scalar_select %p235_p8, %s772_s19, 1  ;;  %vm330_vm11 = vcmp.eq.s32.totalorder %v309_v11, 0  ;;  %vm356_vm12 = vcmp.eq.s32.totalorder %v309_v11, 1 }
  0x4d   : > { %s389_s11 = sshll.u32 %s228_s13, 4  ;;  %s387_s30 = scalar_lea.hbm %s937_s3, %s512_s12  ;;  %s390_s11 = int_to_ptr.vmem [resolvable:$true] %s389_s11 }
  0x4e   : > { %521 = vmatpush3.bf16.msra.mxu0 %v589_v2  ;;  %s506_s26 = sshll.u32 %s236_s24, 3  ;;  %s372_s5 = scalar_lea.sflag [#allocation4], %s858_s25 }
  0x4f   : > { %s238_s7 = scalar_lea.vmem %s938_s4, %s506_s26  ;;  %s648_s6 = scalar_lea.vmem %s390_s11, 128 }
  0x50   : > { %p649_p3 = scmp.ne.s32.totalorder %s390_s11, %s648_s6  ;;  %p958_p11 = scmp.ne.s32.totalorder %s948_s10, 0 }
  0x51   : > { %523 = vmatmul.mubr.msk.bf16.vlgmr.msra.gmra.mxu0 %vm264_vm1, %v240_v3  ;;  %s725_s21 = smov [#allocation7]  }
  0x52   : > { %p650_p7 = pnand %p649_p3, %p958_p11  ;;  %s652_s23 = sshll.u32 %s725_s21, 4  ;;  %s653_s23 = int_to_ptr.vmem [resolvable:$false] %s652_s23 }
  0x53   : > { %s654_s19 = scalar_lea.vmem %s653_s23, 256  ;;  %p655_p2 = scmp.lt.s32.totalorder %s390_s11, %s653_s23 }
  0x54   : > { %p651_p10 = pneg %p650_p7  ;;  %p656_p13 = scmp.lt.s32.totalorder %s654_s19, %s648_s6 }
  0x56   : > { %p657_p0 = por %p656_p13, %p655_p2 }
  0x58   : > { %p658_p5 = pnand %p657_p0, %p651_p10 }
 0x111   : > { %v302_v5 = vpop.f32.mrf.mxu0 }
 0x112   : > { %v303_v6 = vadd.f32 %v507_v4, %v302_v5 }
 0x113   : > { %v524_v7 = vpop.f32.mrf.mxu0 }
 0x114   : > { %310 = vmax.xlane.f32.xlu0 %v303_v6 }
 0x115   : > { %v305_v8 = vpop.f32.mrf.mxu0 }
 0x117   : > { %v525_v9 = vpop.f32.mrf.mxu0 }
 0x19d   : > { %v311_v12 = vpop.xlane.xlu0 %310 }
 0x19e   : > { %vm312_vm2 = vcmp.eq.f32.partialorder %v303_v6, %v311_v12 }
 0x19f   : > { %v313_v13 = vsel %vm312_vm2, %v309_v11, 128 }
 0x1a0   : > { %v315_v14 = vshra.s32 %v313_v13, 16  ;;  %v314_v16 = vand.u32 65535, %v313_v13 }
 0x1a2   : > { %v317_v15 = vcvt.s32.f32 %v315_v14  ;;  %v316_v18 = vcvt.s32.f32 %v314_v16 }
 0x1a4   : > { %318 = vmin.xlane.f32.xlu0 %v317_v15 }
 0x22d   : > { %v319_v17 = vpop.xlane.xlu0 %318 }
 0x22e   : > { %vm320_vm3 = vcmp.eq.f32.partialorder %v317_v15, %v319_v17  ;;  %v325_v20 = vcvt.f32.s32 %v319_v17 }
 0x22f   : > { %v321_v19 = vsel %vm320_vm3, %v316_v18, inf }
 0x230   : > { %322 = vmin.xlane.f32.xlu1 %v321_v19  ;;  %v326_v22 = vshll.u32 %v325_v20, 16 }
 0x2b9   : > { %v323_v21 = vpop.xlane.xlu1 %322 }
 0x2ba   : > { %v324_v23 = vcvt.f32.s32 %v323_v21 }
 0x2bc   : > { %v327_v24 = vadd.s32 %v326_v22, %v324_v23 }
 0x2be   : > { %vm328_vm4 = vcmp.eq.s32.totalorder %v309_v11, %v327_v24  ;;  %v331_v41 = vsel %vm330_vm11, %v327_v24, 0 }
 0x2bf   : > { %vm875_vm5 = vmand %vm312_vm2, %vm328_vm4 }
 0x2c0   : > { %v332_v26 = vsel %vm875_vm5, -inf, %v303_v6  ;;  %vm336_vm7 = vmxor %vm875_vm5, %vm724_vm6 }
 0x2c1   : > { %333 = vmax.xlane.f32.xlu1 %v332_v26 }
 0x34a   : > { %v334_v27 = vpop.xlane.xlu1 %333 }
 0x34b   : > { %vm335_vm8 = vcmp.eq.f32.partialorder %v332_v26, %v334_v27 }
 0x34c   : > { %vm883_vm9 = vmand %vm335_vm8, %vm336_vm7 }
 0x34d   : > { %v338_v29 = vsel %vm883_vm9, %v309_v11, 128 }
 0x34e   : > { %v340_v30 = vshra.s32 %v338_v29, 16  ;;  %v339_v32 = vand.u32 65535, %v338_v29 }
 0x350   : > { %v342_v31 = vcvt.s32.f32 %v340_v30  ;;  %v341_v34 = vcvt.s32.f32 %v339_v32 }
 0x352   : > { %343 = vmin.xlane.f32.xlu0 %v342_v31 }
 0x3db   : > { %v344_v33 = vpop.xlane.xlu0 %343 }
 0x3dc   : > { %vm345_vm10 = vcmp.eq.f32.partialorder %v342_v31, %v344_v33  ;;  %v350_v36 = vcvt.f32.s32 %v344_v33 }
 0x3dd   : > { %v346_v35 = vsel %vm345_vm10, %v341_v34, inf }
 0x3de   : > { %347 = vmin.xlane.f32.xlu1 %v346_v35  ;;  %v351_v38 = vshll.u32 %v350_v36, 16 }
 0x467   : > { %v348_v37 = vpop.xlane.xlu1 %347 }
 0x468   : > { %v349_v39 = vcvt.f32.s32 %v348_v37 }
 0x46a   : > { %v352_v40 = vadd.s32 %v351_v38, %v349_v39 }
 0x46c   : > { %v357_v42 = vsel %vm356_vm12, %v352_v40, %v331_v41  ;;  %vm353_vm14 = vcmp.eq.s32.totalorder %v309_v11, %v352_v40 }
 0x46d   : > { %370 = vst.msk [vmem:[%s238_s7] sm:$0xff] %vm369_vm13, %v357_v42  ;;  %vm354_vm15 = vmand %vm883_vm9, %vm353_vm14 }
 0x46e   : > { %vm355_vm0 = vmor %vm875_vm5, %vm354_vm15 }
 0x46f   : > { %v358_v43 = vsel %vm355_vm0, %v303_v6, -inf }
 0x470   : > { %359 = vmax.xlane.f32.xlu0 %v358_v43 }
 0x4f9   : > { %v360_v44 = vpop.xlane.xlu0 %359 }
 0x4fa   : > { %v361_v45 = vsub.f32 %v358_v43, %v360_v44 }
 0x4fc   : > { %v362_v46 = vmul.f32 1.442695, %v361_v45 }
 0x4fe   : > { %590 = vpow2.f32 %v362_v46 }
 0x50b   : > { %v591_v47 = vpop.eup %590 }
 0x50c   : > { %364 = vadd.xlane.f32.xlu1 %v591_v47 }
 0x595   : > { %v365_v48 = vpop.xlane.xlu1 %364 }
 0x596   : > { %592 = vrcp.f32 %v365_v48 }
 0x5a3   : > { %v593_v49 = vpop.eup %592 }
 0x5a4   : > { %v367_v50 = vmul.f32 %v593_v49, %v591_v47 }
 0x5a6   : > { %368 = vst [vmem:[%s228_s13] sm:$0xff] %v367_v50 }
 0x5a7   : > { %661 = shalt.err (!%p658_p5)
}
 0x5a8   : > { %s662_s24 = scalar_lea.hbm %s387_s30, 128  ;;  %s666_s28 = scalar_lea.hbm %s937_s3, 256 }
 0x5a9   : > { %p663_p9 = scmp.ne.s32.totalorder %s387_s30, %s662_s24  ;;  %p667_p4 = scmp.lt.s32.totalorder %s387_s30, %s937_s3 }
 0x5aa   : > { %p668_p6 = scmp.lt.s32.totalorder %s666_s28, %s662_s24 }
 0x5ab   : > { %p664_p12 = pnand %p663_p9, %p958_p11 }
 0x5ac   : > { %p669_p8 = por %p668_p6, %p667_p4 }
 0x5ad   : > { %p665_p1 = pneg %p664_p12 }
 0x5af   : > { %p670_p3 = pnand %p669_p8, %p665_p1 }
 0x5b1   : > { %673 = shalt.err (!%p670_p3)
}
 0x5b2   : > { %532 = dma.vmem_to_hbm [thread:$0]  (%p958_p11), %s390_s11, 128, %s387_s30, %s372_s5  }
 0x5b3 PF: > { %s404_s8 = sand.u32 1, %s704_s15   ;;  %p959_p7 = scmp.ne.s32.totalorder %s944_s22, 0 }
 0x5b4   : > { %p960_p10 = scmp.ge.s32.totalorder %s716_s18, 2  ;;  %s405_s12 = scalar_lea.sflag [#allocation4], %s404_s8 }
 0x5b6   : > { %p543_p2 = pnand %p960_p10, %p959_p7 }
 0x5b8   : > { %p544_p13 = pneg %p543_p2 }
 0x5ba   : > { %699 = dma.done.wait (%p544_p13), %s405_s12, 128  }
 0x5bb   : > { %701 = vsyncadd (%p544_p13), %s405_s12, 4294967168  ;;  %p19_p0 = scmp.ge.s32.totalorder %s805_s27, 4   ;;  %s961_s15 = smov %s708_s16 }
 0x5bc   : > { %s962_s16 = smov %s712_s17  ;;  %s963_s17 = smov %s822_s9 }
 0x5bd   : > { %s964_s18 = smov %s805_s27  ;;  %21 = sbr.rel (!%p19_p0) target bundleno = 6 (0x6), region = 93 }
 0x5c2   :  { %417 = vsyncpa [#allocation3], 1 }
 0x5c3   :  { %419 = vsyncpa [#allocation3 + $0x1], 1 }
 0x5c4   :  { %420 = vsyncpa [#allocation6], 1 }
 0x5c5   :  { %421 = vsyncpa [#allocation4], 1 }
 0x5c6   :  { %423 = vsyncpa [#allocation4 + $0x1], 1 }

</bundles_post_ra>
